<compile_context>
chip_gen: v5e
topology: v5e:2x2
jax: 0.10.0
libtpu: 0.0.40
codegen_flags: <defaults>
</compile_context>

<pallas_src>
import jax
import jax.numpy as jnp
from jax.experimental import pallas as pl
from jax.experimental.pallas import tpu as pltpu


def _pick_block_rows(batch: int, cap: int = 4096) -> int:
    """Row-block size: whole batch when small, else ~half the batch (rounded up
    to a sublane multiple of 8) so the parallel grid has >= 2 steps, capped."""
    if batch <= 256:
        return batch  # single grid step; per-step overhead already negligible
    half = -(-batch // 2)            # ceil(B / 2)
    half = ((half + 7) // 8) * 8     # round up to a multiple of 8 (sublane)
    return min(cap, half)


def split_output_head(w2, b2):
    """One-time host-side split of the (h_half, 2*latent) head into lane-aligned halves."""
    latent = w2.shape[1] // 2
    return (w2[:, :latent], b2[:, :latent], w2[:, latent:], b2[:, latent:])


def dynamic_predictor_kernel(h_ref, w1_ref, b1_ref,
                             w2m_ref, b2m_ref, w2s_ref, b2s_ref,
                             eps_ref, out_ref):
    # Hidden layer: Linear + ReLU (MXU matmul, f32 accumulate).
    x = jnp.dot(h_ref[...], w1_ref[...], preferred_element_type=jnp.float32)
    x = jnp.maximum(x + b1_ref[...], 0.0)

    # Output head as two lane-aligned matmuls (mean head / log_std head).
    mean = jnp.dot(x, w2m_ref[...], preferred_element_type=jnp.float32) + b2m_ref[...]
    log_std = jnp.dot(x, w2s_ref[...], preferred_element_type=jnp.float32) + b2s_ref[...]

    # Softplus + floor (EUP exp/log path), then reparameterized sample.
    std = jax.nn.softplus(log_std) + 1e-6
    sample = mean + std * eps_ref[...]

    # Leading-axis stores (no lane-axis concat / shuffles): out = [mean; std; sample].
    out_ref[0] = mean
    out_ref[1] = std
    out_ref[2] = sample


def dynamic_predictor(h_t, w1, b1, w2_mean, b2_mean, w2_logstd, b2_logstd, eps):
    """Full DynamicPredictor forward as a single Pallas kernel.

    Weights are stored (in_features, out_features); the output head is pre-split
    into mean / log_std halves (see `split_output_head`).

    Returns (mean, std, sample).  The torch.distributions.Normal object has no
    kernel equivalent; its defining parameters (mean, std) are returned instead.
    """
    B, H = h_t.shape
    h_half = w1.shape[1]
    latent = w2_mean.shape[1]
    block_rows = _pick_block_rows(B)
    grid = (pl.cdiv(B, block_rows),)   # ragged last block is fine (masked store)

    pinned = lambda shape: pl.BlockSpec(shape, lambda i: (0, 0))      # grid-invariant
    rows = lambda ncols: pl.BlockSpec((block_rows, ncols), lambda i: (i, 0))

    packed = pl.pallas_call(
        dynamic_predictor_kernel,
        out_shape=jax.ShapeDtypeStruct((3, B, latent), jnp.float32),
        grid=grid,
        in_specs=[
            rows(H),                    # h_t        (blocked over rows)
            pinned((H, h_half)),        # w1
            pinned((1, h_half)),        # b1
            pinned((h_half, latent)),   # w2_mean
            pinned((1, latent)),        # b2_mean
            pinned((h_half, latent)),   # w2_logstd
            pinned((1, latent)),        # b2_logstd
            rows(latent),               # eps        (blocked over rows)
        ],
        out_specs=pl.BlockSpec((3, block_rows, latent), lambda i: (0, i, 0)),
        compiler_params=pltpu.CompilerParams(
            dimension_semantics=("parallel",)),  # v7x: row blocks split across both TCs
    )(h_t, w1, b1, w2_mean, b2_mean, w2_logstd, b2_logstd, eps)

    mean = packed[0]
    std = packed[1]
    sample = packed[2]
    return mean, std, sample


def _reference(h_t, w1, b1, w2, b2, eps, latent):
    x = jnp.maximum(h_t @ w1 + b1, 0.0)
    y = x @ w2 + b2
    mean, log_std = y[:, :latent], y[:, latent:]
    std = jax.nn.softplus(log_std) + 1e-6
    return mean, std, mean + std * eps


if __name__ == "__main__":
    # Config: batch=8, hidden_dim=32, latent_dim=16 (small, as in the module).
    batch_size = 8
    hidden_dim = 32
    latent_dim = 16
    h_half = hidden_dim // 2

    key = jax.random.PRNGKey(0)
    k_h, k_w1, k_b1, k_w2, k_b2, k_eps, k_hbig, k_ebig = jax.random.split(key, 8)

    h_t = jax.random.normal(k_h, (batch_size, hidden_dim), dtype=jnp.float32)

    # Deterministic parameter init (Linear weights stored (in, out)).
    w1 = jax.random.normal(k_w1, (hidden_dim, h_half), jnp.float32) * 0.1
    b1 = jax.random.normal(k_b1, (1, h_half), jnp.float32) * 0.1
    w2 = jax.random.normal(k_w2, (h_half, 2 * latent_dim), jnp.float32) * 0.1
    b2 = jax.random.normal(k_b2, (1, 2 * latent_dim), jnp.float32) * 0.1

    # One-time host-side split of the output head into lane-aligned halves.
    w2_mean, b2_mean, w2_logstd, b2_logstd = split_output_head(w2, b2)

    # Reparameterization noise for rsample (generated outside the kernel).
    eps = jax.random.normal(k_eps, (batch_size, latent_dim), jnp.float32)

    mean, std, sample = dynamic_predictor(
        h_t, w1, b1, w2_mean, b2_mean, w2_logstd, b2_logstd, eps)
    jax.block_until_ready((mean, std, sample))

    mean_ref, std_ref, sample_ref = _reference(h_t, w1, b1, w2, b2, eps, latent_dim)
    assert jnp.allclose(mean, mean_ref, atol=1e-5), "mean mismatch"
    assert jnp.allclose(std, std_ref, atol=1e-5), "std mismatch"
    assert jnp.allclose(sample, sample_ref, atol=1e-5), "sample mismatch"

    # Larger, non-divisible batch: exercises the 2-step parallel grid and the
    # ragged (masked) last block  (block_rows = 504, blocks = 504 + 496).
    big_b = 1000
    h_big = jax.random.normal(k_hbig, (big_b, hidden_dim), jnp.float32)
    eps_big = jax.random.normal(k_ebig, (big_b, latent_dim), jnp.float32)
    mean_b, std_b, sample_b = dynamic_predictor(
        h_big, w1, b1, w2_mean, b2_mean, w2_logstd, b2_logstd, eps_big)
    jax.block_until_ready((mean_b, std_b, sample_b))

    mean_bref, std_bref, sample_bref = _reference(h_big, w1, b1, w2, b2, eps_big, latent_dim)
    assert jnp.allclose(mean_b, mean_bref, atol=1e-5), "batched mean mismatch"
    assert jnp.allclose(std_b, std_bref, atol=1e-5), "batched std mismatch"
    assert jnp.allclose(sample_b, sample_bref, atol=1e-5), "batched sample mismatch"

    print("KERNEL_OK")
</pallas_src>

<mosaic_0001>
module attributes {stable_mosaic.version = 11 : i64} {
  func.func @dynamic_predictor_kernel(%arg0: i32, %arg1: memref<8x32xf32, #tpu.memory_space<vmem>>, %arg2: memref<32x16xf32, #tpu.memory_space<vmem>>, %arg3: memref<1x16xf32, #tpu.memory_space<vmem>>, %arg4: memref<16x16xf32, #tpu.memory_space<vmem>>, %arg5: memref<1x16xf32, #tpu.memory_space<vmem>>, %arg6: memref<16x16xf32, #tpu.memory_space<vmem>>, %arg7: memref<1x16xf32, #tpu.memory_space<vmem>>, %arg8: memref<8x16xf32, #tpu.memory_space<vmem>>, %arg9: memref<3x8x16xf32, #tpu.memory_space<vmem>>) attributes {dimension_semantics = [#tpu.dimension_semantics<parallel>], iteration_bounds = array<i64: 1>, scalar_prefetch = 0 : i64, scratch_operands = 0 : i64, tpu.core_type = #tpu.core_type<tc>, window_params = [{transform_indices = @transform_0, window_bounds = array<i64: 8, 32>}, {pipeline_mode = #tpu.pipeline_mode<synchronous>, transform_indices = @transform_1, window_bounds = array<i64: 32, 16>}, {pipeline_mode = #tpu.pipeline_mode<synchronous>, transform_indices = @transform_2, window_bounds = array<i64: 1, 16>}, {pipeline_mode = #tpu.pipeline_mode<synchronous>, transform_indices = @transform_3, window_bounds = array<i64: 16, 16>}, {pipeline_mode = #tpu.pipeline_mode<synchronous>, transform_indices = @transform_4, window_bounds = array<i64: 1, 16>}, {pipeline_mode = #tpu.pipeline_mode<synchronous>, transform_indices = @transform_5, window_bounds = array<i64: 16, 16>}, {pipeline_mode = #tpu.pipeline_mode<synchronous>, transform_indices = @transform_6, window_bounds = array<i64: 1, 16>}, {transform_indices = @transform_7, window_bounds = array<i64: 8, 16>}, {transform_indices = @transform_8, window_bounds = array<i64: 3, 8, 16>}]} {
    %c0 = arith.constant 0 : index
    %c0_0 = arith.constant 0 : index
    %0 = vector.load %arg1[%c0, %c0_0] : memref<8x32xf32, #tpu.memory_space<vmem>>, vector<8x32xf32>
    %c0_1 = arith.constant 0 : index
    %c0_2 = arith.constant 0 : index
    %1 = vector.load %arg2[%c0_1, %c0_2] : memref<32x16xf32, #tpu.memory_space<vmem>>, vector<32x16xf32>
    %cst = arith.constant dense<0.000000e+00> : vector<8x16xf32>
    %2 = tpu.matmul %0, %1, %cst {dimension_numbers = #tpu.dot_dimension_numbers<[1], [0], [0], [1], [0, 0, 1, 1], [], []>} : vector<8x32xf32>, vector<32x16xf32>, vector<8x16xf32> -> vector<8x16xf32>
    %c0_3 = arith.constant 0 : index
    %c0_4 = arith.constant 0 : index
    %3 = vector.load %arg3[%c0_3, %c0_4] : memref<1x16xf32, #tpu.memory_space<vmem>>, vector<1x16xf32>
    %4 = vector.broadcast %3 : vector<1x16xf32> to vector<8x16xf32>
    %5 = arith.addf %2, %4 : vector<8x16xf32>
    %cst_5 = arith.constant 0.000000e+00 : f32
    %6 = vector.broadcast %cst_5 : f32 to vector<8x16xf32>
    %7 = arith.maximumf %5, %6 : vector<8x16xf32>
    %c0_6 = arith.constant 0 : index
    %c0_7 = arith.constant 0 : index
    %8 = vector.load %arg4[%c0_6, %c0_7] : memref<16x16xf32, #tpu.memory_space<vmem>>, vector<16x16xf32>
    %cst_8 = arith.constant dense<0.000000e+00> : vector<8x16xf32>
    %9 = tpu.matmul %7, %8, %cst_8 {dimension_numbers = #tpu.dot_dimension_numbers<[1], [0], [0], [1], [0, 0, 1, 1], [], []>} : vector<8x16xf32>, vector<16x16xf32>, vector<8x16xf32> -> vector<8x16xf32>
    %c0_9 = arith.constant 0 : index
    %c0_10 = arith.constant 0 : index
    %10 = vector.load %arg5[%c0_9, %c0_10] : memref<1x16xf32, #tpu.memory_space<vmem>>, vector<1x16xf32>
    %11 = vector.broadcast %10 : vector<1x16xf32> to vector<8x16xf32>
    %12 = arith.addf %9, %11 : vector<8x16xf32>
    %c0_11 = arith.constant 0 : index
    %c0_12 = arith.constant 0 : index
    %13 = vector.load %arg6[%c0_11, %c0_12] : memref<16x16xf32, #tpu.memory_space<vmem>>, vector<16x16xf32>
    %cst_13 = arith.constant dense<0.000000e+00> : vector<8x16xf32>
    %14 = tpu.matmul %7, %13, %cst_13 {dimension_numbers = #tpu.dot_dimension_numbers<[1], [0], [0], [1], [0, 0, 1, 1], [], []>} : vector<8x16xf32>, vector<16x16xf32>, vector<8x16xf32> -> vector<8x16xf32>
    %c0_14 = arith.constant 0 : index
    %c0_15 = arith.constant 0 : index
    %15 = vector.load %arg7[%c0_14, %c0_15] : memref<1x16xf32, #tpu.memory_space<vmem>>, vector<1x16xf32>
    %16 = vector.broadcast %15 : vector<1x16xf32> to vector<8x16xf32>
    %17 = arith.addf %14, %16 : vector<8x16xf32>
    %cst_16 = arith.constant 0.000000e+00 : f32
    %18 = vector.broadcast %cst_16 : f32 to vector<8x16xf32>
    %19 = arith.maximumf %17, %18 : vector<8x16xf32>
    %20 = vector.broadcast %cst_16 : f32 to vector<8x16xf32>
    %21 = arith.subf %17, %20 : vector<8x16xf32>
    %22 = arith.cmpf one, %21, %21 : vector<8x16xf32>
    %23 = vector.broadcast %cst_16 : f32 to vector<8x16xf32>
    %24 = arith.addf %17, %23 : vector<8x16xf32>
    %25 = math.absf %21 : vector<8x16xf32>
    %cst_17 = arith.constant 0.000000e+00 : f32
    %26 = vector.broadcast %cst_17 : f32 to vector<8x16xf32>
    %27 = arith.subf %26, %25 : vector<8x16xf32>
    %28 = math.exp %27 : vector<8x16xf32>
    %29 = math.log1p %28 : vector<8x16xf32>
    %30 = arith.addf %19, %29 : vector<8x16xf32>
    %31 = arith.select %22, %24, %30 : vector<8x16xi1>, vector<8x16xf32>
    %cst_18 = arith.constant 9.99999997E-7 : f32
    %32 = vector.broadcast %cst_18 : f32 to vector<8x16xf32>
    %33 = arith.addf %31, %32 : vector<8x16xf32>
    %c0_19 = arith.constant 0 : index
    %c0_20 = arith.constant 0 : index
    %34 = vector.load %arg8[%c0_19, %c0_20] : memref<8x16xf32, #tpu.memory_space<vmem>>, vector<8x16xf32>
    %35 = arith.mulf %33, %34 : vector<8x16xf32>
    %36 = arith.addf %12, %35 : vector<8x16xf32>
    %c0_21 = arith.constant 0 : index
    %c0_22 = arith.constant 0 : index
    %c0_23 = arith.constant 0 : index
    %37 = vector.load %arg9[%c0_21, %c0_22, %c0_23] : memref<3x8x16xf32, #tpu.memory_space<vmem>>, vector<1x8x16xf32>
    %38 = vector.shape_cast %37 : vector<1x8x16xf32> to vector<8x16xf32>
    %39 = vector.shape_cast %12 : vector<8x16xf32> to vector<1x8x16xf32>
    tpu.vector_store %arg9[%c0_21, %c0_22, %c0_23], %39 {strides = array<i32>} : memref<3x8x16xf32, #tpu.memory_space<vmem>>, vector<1x8x16xf32>,
    %c1 = arith.constant 1 : index
    %c0_24 = arith.constant 0 : index
    %c0_25 = arith.constant 0 : index
    %40 = vector.load %arg9[%c1, %c0_24, %c0_25] : memref<3x8x16xf32, #tpu.memory_space<vmem>>, vector<1x8x16xf32>
    %41 = vector.shape_cast %40 : vector<1x8x16xf32> to vector<8x16xf32>
    %42 = vector.shape_cast %33 : vector<8x16xf32> to vector<1x8x16xf32>
    tpu.vector_store %arg9[%c1, %c0_24, %c0_25], %42 {strides = array<i32>} : memref<3x8x16xf32, #tpu.memory_space<vmem>>, vector<1x8x16xf32>,
    %c2 = arith.constant 2 : index
    %c0_26 = arith.constant 0 : index
    %c0_27 = arith.constant 0 : index
    %43 = vector.load %arg9[%c2, %c0_26, %c0_27] : memref<3x8x16xf32, #tpu.memory_space<vmem>>, vector<1x8x16xf32>
    %44 = vector.shape_cast %43 : vector<1x8x16xf32> to vector<8x16xf32>
    %45 = vector.shape_cast %36 : vector<8x16xf32> to vector<1x8x16xf32>
    tpu.vector_store %arg9[%c2, %c0_26, %c0_27], %45 {strides = array<i32>} : memref<3x8x16xf32, #tpu.memory_space<vmem>>, vector<1x8x16xf32>,
    return
  }
  func.func @transform_0(%arg0: i32) -> (i32, i32) {
    %c0_i32 = arith.constant 0 : i32
    %c0_i32_0 = arith.constant 0 : i32
    return %arg0, %c0_i32 : i32, i32
  }
  func.func @transform_1(%arg0: i32) -> (i32, i32) {
    %c0_i32 = arith.constant 0 : i32
    %c0_i32_0 = arith.constant 0 : i32
    %c0_i32_1 = arith.constant 0 : i32
    return %c0_i32, %c0_i32_0 : i32, i32
  }
  func.func @transform_2(%arg0: i32) -> (i32, i32) {
    %c0_i32 = arith.constant 0 : i32
    %c0_i32_0 = arith.constant 0 : i32
    %c0_i32_1 = arith.constant 0 : i32
    return %c0_i32, %c0_i32_0 : i32, i32
  }
  func.func @transform_3(%arg0: i32) -> (i32, i32) {
    %c0_i32 = arith.constant 0 : i32
    %c0_i32_0 = arith.constant 0 : i32
    %c0_i32_1 = arith.constant 0 : i32
    return %c0_i32, %c0_i32_0 : i32, i32
  }
  func.func @transform_4(%arg0: i32) -> (i32, i32) {
    %c0_i32 = arith.constant 0 : i32
    %c0_i32_0 = arith.constant 0 : i32
    %c0_i32_1 = arith.constant 0 : i32
    return %c0_i32, %c0_i32_0 : i32, i32
  }
  func.func @transform_5(%arg0: i32) -> (i32, i32) {
    %c0_i32 = arith.constant 0 : i32
    %c0_i32_0 = arith.constant 0 : i32
    %c0_i32_1 = arith.constant 0 : i32
    return %c0_i32, %c0_i32_0 : i32, i32
  }
  func.func @transform_6(%arg0: i32) -> (i32, i32) {
    %c0_i32 = arith.constant 0 : i32
    %c0_i32_0 = arith.constant 0 : i32
    %c0_i32_1 = arith.constant 0 : i32
    return %c0_i32, %c0_i32_0 : i32, i32
  }
  func.func @transform_7(%arg0: i32) -> (i32, i32) {
    %c0_i32 = arith.constant 0 : i32
    %c0_i32_0 = arith.constant 0 : i32
    return %arg0, %c0_i32 : i32, i32
  }
  func.func @transform_8(%arg0: i32) -> (i32, i32, i32) {
    %c0_i32 = arith.constant 0 : i32
    %c0_i32_0 = arith.constant 0 : i32
    %c0_i32_1 = arith.constant 0 : i32
    return %c0_i32, %arg0, %c0_i32_0 : i32, i32, i32
  }
}

</mosaic_0001>

<bundles_post_ra>
// kernel: tpu_custom_call.1
= control target key start
LH: loop header
LB: loop body
LE: loop exit
PB: predicated region body
PF: predicated region fallthrough
CT: control target
= control target key end

     0   :  { %s299_s0 = inlined_call_operand.vmem [shape: f32[8,32], index: 0, kind: input, shape index: {}]   ;;  %s300_s1 = inlined_call_operand.vmem [shape: f32[32,16], index: 1, kind: input, shape index: {}]   ;;  %s301_s2 = inlined_call_operand.vmem [shape: f32[1,16], index: 2, kind: input, shape index: {}]   ;;  %s302_s3 = inlined_call_operand.vmem [shape: f32[16,16], index: 3, kind: input, shape index: {}]   ;;  %s303_s4 = inlined_call_operand.vmem [shape: f32[1,16], index: 4, kind: input, shape index: {}]   ;;  %s304_s5 = inlined_call_operand.vmem [shape: f32[16,16], index: 5, kind: input, shape index: {}]   ;;  %s305_s6 = inlined_call_operand.vmem [shape: f32[1,16], index: 6, kind: input, shape index: {}]   ;;  %s306_s7 = inlined_call_operand.vmem [shape: f32[8,16], index: 7, kind: input, shape index: {}]   ;;  %s307_s8 = inlined_call_operand.hbm [shape: f32[3,8,16], index: 8, kind: output, shape index: {}]  }
   0x1   :  { %v34_v0 = vld [vmem:[%s300_s1 + $0x18] sm:$0xff]  ;;  %v33_v1 = vld [vmem:[%s300_s1 + $0x10] sm:$0xff]  ;;  %v32_v2 = vld [vmem:[%s300_s1 + $0x8] sm:$0xff] }
   0x2   :  { %55 = vmatpush.msra.mxu0 %v34_v0 }
   0x4   :  { %56 = vmatpush.msra.mxu0 %v33_v1 }
   0x5   :  { %13 = vsyncpa [#allocation3], 0  ;;  %v31_v3 = vld [vmem:[%s300_s1] sm:$0xff]  ;;  %vm39_vm0 = vcmask 261120   ;;  %v65_v5 = vld [vmem:[%s302_s3 + $0x8] sm:$0xff]  ;;  %vm70_vm1 = vcmask 130048  }
   0x6   :  { %57 = vmatpush.msra.mxu0 %v32_v2  ;;  %v30_v4 = vld [vmem:[%s299_s0] sm:$0xff]  ;;  %v95_v6 = vld [vmem:[%s304_s5 + $0x8] sm:$0xff]  ;;  %88 = vmatpush.msra.mxu1 %v65_v5  ;;  %s153_s28 = sshll.u32 %s307_s8, 4  ;;  %s205_s29 = smov 128   ;;  %s154_s28 = int_to_ptr.hbm [resolvable:$true] %s153_s28 }
   0x7   :  { %114 = vmatpush.msra.mxu2 %v95_v6  ;;  %v64_v7 = vld [vmem:[%s302_s3] sm:$0xff]  ;;  %s206_s30 = smov 8  }
   0x8   :  { %58 = vmatpush.msra.mxu0 %v31_v3  ;;  %v94_v8 = vld [vmem:[%s304_s5] sm:$0xff]  ;;  %89 = vmatpush.msra.mxu1 %v64_v7 }
   0x9   :  { %165 = vmatmul.msk.f32.vlgmr.msra.gmra.mxu0 %vm39_vm0, %v30_v4  ;;  %115 = vmatpush.msra.mxu2 %v94_v8  ;;  %v171_v9 = vld [vmem:[%s301_s2] ss:$0 sm:$0xff] }
   0xa   :  { %v172_v13 = vld [vmem:[%s303_s4] ss:$0 sm:$0xff] }
   0xb   :  { %v173_v16 = vld [vmem:[%s305_s6] ss:$0 sm:$0xff]  ;;  %s204_s6 = smov [#allocation2]  }
   0xc   :  { %v139_v34 = vld [vmem:[%s306_s7] sm:$0xff]  ;;  %s151_s25 = sshll.u32 %s204_s6, 4  ;;  %s152_s25 = int_to_ptr.vmem [resolvable:$true] %s151_s25 }
  0x86   :  { %v60_v10 = vpop.f32.mrf.mxu0 }
  0x87   :  { %v61_v11 = vadd.f32 %v171_v9, %v60_v10 }
  0x89   :  { %v63_v12 = vmax.f32 %v61_v11, 0.0 }
  0x8b   :  { %166 = vmatmul.msk.f32.vlgmr.msra.gmra.mxu1 %vm70_vm1, %v63_v12  ;;  %167 = vmatmul.msk.f32.vlgmr.msra.gmra.mxu2 %vm70_vm1, %v63_v12 }
 0x108   :  { %v91_v14 = vpop.f32.mrf.mxu1 }
 0x109   :  { %v92_v15 = vadd.f32 %v172_v13, %v91_v14 }
 0x10b   :  { %142 = vst.msk [vmem:[#allocation2] sm:$0xff] %vm70_vm1, %v92_v15 }
 0x10e   :  { %v117_v17 = vpop.f32.mrf.mxu2 }
 0x10f   :  { %v118_v18 = vadd.f32 %v173_v16, %v117_v17 }
 0x111   :  { %v123_v19 = vand.u32 2147483647, %v118_v18  ;;  %v120_v30 = vmax.f32 %v118_v18, 0.0  ;;  %vm121_vm3 = vcmp.ne.f32.partialorder %v118_v18, %v118_v18 }
 0x113   :  { %v124_v20 = vsub.f32 0.0, %v123_v19 }
 0x115   :  { %v125_v21 = vmul.f32 1.442695, %v124_v20 }
 0x117   :  { %174 = vpow2.f32 %v125_v21 }
 0x11d   :  { %v175_v22 = vpop.eup %174 }
 0x11e   :  { %v127_v23 = vadd.f32 1.0, %v175_v22  ;;  %v130_v24 = vmul.f32 -0.5, %v175_v22  ;;  %v133_v26 = vand.u32 2147483647, %v175_v22 }
 0x120   :  { %176 = vlog2.f32 %v127_v23  ;;  %v131_v25 = vadd.f32 1.0, %v130_v24  ;;  %vm134_vm2 = vcmp.lt.f32.partialorder %v133_v26, 0.0004427343 }
 0x122   :  { %v132_v29 = vmul.f32 %v175_v22, %v131_v25 }
 0x126   :  { %v177_v27 = vpop.eup %176 }
 0x127   :  { %v129_v28 = vmul.f32 0.6931472, %v177_v27 }
 0x129   :  { %v135_v31 = vsel %vm134_vm2, %v132_v29, %v129_v28 }
 0x12a   :  { %v136_v32 = vadd.f32 %v135_v31, %v120_v30 }
 0x12c   :  { %v137_v33 = vsel %vm121_vm3, %v118_v18, %v136_v32 }
 0x12d   :  { %v138_v35 = vadd.f32 1e-06, %v137_v33 }
 0x12f   :  { %v140_v36 = vmul.f32 %v139_v34, %v138_v35  ;;  %144 = vst.msk [vmem:[#allocation2 + $0x8] sm:$0xff] %vm70_vm1, %v138_v35 }
 0x131   :  { %v141_v37 = vadd.f32 %v140_v36, %v92_v15 }
 0x133   :  { %146 = vst.msk [vmem:[#allocation2 + $0x10] sm:$0xff] %vm70_vm1, %v141_v37 }
 0x134   :  { %159 = dma.vmem_to_hbm [thread:$0]  %s152_s25, 384, %s154_s28, [#allocation3], %s205_s29, %s205_s29, %s206_s30  }
 0x135   :  { %202 = dma.done.wait [#allocation3], 384  }
 0x136   :  { %203 = vsyncadd [#allocation3], 4294966912 }
 0x137   :  { %164 = vsyncpa [#allocation3], 1 }

</bundles_post_ra>
